<compile_context>
chip_gen: v7x
topology: tpu7x:2x2x1
jax: 0.10.0
libtpu: 0.0.40
codegen_flags: <defaults>
</compile_context>

<pallas_src>
import math
import numpy as np
import jax
import jax.numpy as jnp
from jax import lax
from jax.experimental import pallas as pl
from jax.experimental.pallas import tpu as pltpu

EPS = 1e-9

# ----------------------------- configuration --------------------------------
IN_CHANNELS = 8
OUT_CHANNELS = 8
KERNEL_SIZE = 3
STRIDE = 1          # padding='same' requires stride == 1
DILATION = 1        # TODO(synk): dilation > 1 needs a second (dilated) reflect pad
GROUPS = 1          # TODO(synk): groups > 1 (block-diagonal weight) not implemented
OFFSET_GROUPS = 1   # TODO(synk): offset_groups == in_channels path not implemented
BATCH = 2
LENGTH = 16


# ------------------------------ Pallas kernel --------------------------------
def _make_fused_kernel(B, L, C, K, O, stride, dilation):
    assert stride == 1 and dilation == 1, "fused kernel assumes stride=dilation=1"
    max_dil = dilation * (K - 1)
    lm = max_dil // 2
    rm = max_dil - lm

    def kernel(x_ref, wmod_ref, wp_ref, alpha_ref, gamma_ref, beta_ref,
               wflat_ref, bias_ref, o_ref):
        # x_ref    : (B, L, C)   input in (batch, length, channel) layout
        # wmod_ref : (K*C, K)    modulation conv weight, tap-major flattened
        # wp_ref   : (C, K)      pointwise offsets conv weight (transposed)
        # alpha_ref: (1,) SMEM   PReLU slope
        # gamma/beta: (1, K)     GlobalLayerNorm affine params
        # wflat_ref: (K*C, O)    deformable conv weight, tap-major flattened
        # bias_ref : (1, O)
        # o_ref    : (B, L, O)
        x = x_ref[...]                                            # (B, L, C) f32

        # ---- reflect 'same' padding along length (static, tiny) ----
        left = [x[:, i:i + 1, :] for i in range(lm, 0, -1)]       # x[lm], ..., x[1]
        right = [x[:, L - 2 - i:L - 1 - i, :] for i in range(rm)] # x[L-2], ...
        xp = jnp.concatenate(left + [x] + right, axis=1)          # (B, Lp, C)

        # d-shifted length-L windows of the padded input; shared between the
        # modulation conv taps and the interpolation FMAs (dilation == 1).
        shifts = [xp[:, d:d + L, :] for d in range(max_dil + 1)]

        # ---- modulation: conv1d(C->K, kernel K, same/reflect) + softmax over taps
        xcat = jnp.concatenate([shifts[kk * dilation] for kk in range(K)], axis=-1)
        xcat2d = xcat.reshape(B * L, K * C)
        logits = jnp.dot(xcat2d, wmod_ref[...],
                         preferred_element_type=jnp.float32)      # (B*L, K)
        logits = logits - jnp.max(logits, axis=-1, keepdims=True)
        e = jnp.exp(logits)
        msk = (e / jnp.sum(e, axis=-1, keepdims=True)).reshape(B, L, K)

        # ---- offsets: pointwise conv (C -> K) -> PReLU -> GlobalLayerNorm ----
        x2d = x.reshape(B * L, C)
        p = jnp.dot(x2d, wp_ref[...], preferred_element_type=jnp.float32)   # (B*L, K)
        alpha = alpha_ref[0]
        p = jnp.where(p >= 0.0, p, alpha * p).reshape(B, L, K)
        inv_n = 1.0 / float(L * K)
        mean = jnp.sum(jnp.sum(p, axis=2, keepdims=True), axis=1, keepdims=True) * inv_n
        dev = p - mean
        var = jnp.sum(jnp.sum(dev * dev, axis=2, keepdims=True),
                      axis=1, keepdims=True) * inv_n
        off = gamma_ref[...] * dev / jnp.sqrt(var + EPS) + beta_ref[...]    # (B, L, K)

        # ---- deformable linear interpolation (shifted-slice FMAs) + mask ----
        # T_j(l) = clamp(l + j*dil + off_j(l), l, l + max_dil)  =>  only the
        # columns l..l+max_dil of the triangle kernel are nonzero.
        z_cols = []
        for j in range(K):                                        # K static -> unrolled
            r = jnp.clip(off[:, :, j:j + 1] + float(j * dilation),
                         0.0, float(max_dil))                     # (B, L, 1)
            y = jnp.maximum(0.0, 1.0 - jnp.abs(r)) * shifts[0]
            for d in range(1, max_dil + 1):
                g = jnp.maximum(0.0, 1.0 - jnp.abs(r - float(d))) # (B, L, 1)
                y = y + g * shifts[d]                             # VPU FMA on (B,L,C)
            z_cols.append(y * msk[:, :, j:j + 1])
        z2d = jnp.concatenate(z_cols, axis=-1).reshape(B * L, K * C)

        # ---- single fused output contraction on the MXU ----
        out = jnp.dot(z2d, wflat_ref[...],
                      preferred_element_type=jnp.float32) + bias_ref[...]   # (B*L, O)
        o_ref[...] = out.reshape(B, L, O)

    return kernel


def fused_pallas_forward(x_blc, wmod, wp, alpha, gamma, beta, wflat, bias):
    B, L, C = x_blc.shape
    K = wp.shape[1]
    O = wflat.shape[1]
    kernel = _make_fused_kernel(B, L, C, K, O, STRIDE, DILATION)
    vmem = pl.BlockSpec(memory_space=pltpu.MemorySpace.VMEM)
    smem = pl.BlockSpec(memory_space=pltpu.MemorySpace.SMEM)
    return pl.pallas_call(
        kernel,
        out_shape=jax.ShapeDtypeStruct((B, L, O), jnp.float32),
        in_specs=[vmem, vmem, vmem, smem, vmem, vmem, vmem, vmem],
        out_specs=vmem,
    )(x_blc, wmod, wp, alpha, gamma, beta, wflat, bias)


# ------------------------------- JAX glue ------------------------------------
def _same_pad_lr(kernel_size, dilation):
    total = dilation * (kernel_size - 1)
    left = total // 2
    return left, total - left


def init_params(key):
    """Parameters in PyTorch layout, initialized exactly like the module."""
    k1, k2 = jax.random.split(key)
    C, O, K = IN_CHANNELS, OUT_CHANNELS, KERNEL_SIZE
    fan_in = (C // GROUPS) * K
    bound = 1.0 / math.sqrt(fan_in)  # kaiming_uniform(a=sqrt(5)) -> U(-1/sqrt(fan_in), ..)
    return {
        "weight": jax.random.uniform(k1, (O, C // GROUPS, K), jnp.float32, -bound, bound),
        "bias": jax.random.uniform(k2, (O,), jnp.float32, -bound, bound),
        # offset_pconv initialized to 0.0, modulation_conv to 0.5 (per module);
        # offset_dconv branch is dead code in the reference forward (overwritten).
        "w_pconv": jnp.zeros((KERNEL_SIZE * OFFSET_GROUPS, C, 1), jnp.float32),
        "w_mod": jnp.full((KERNEL_SIZE, C, KERNEL_SIZE), 0.5, jnp.float32),
        "prelu_alpha": jnp.full((1,), 0.25, jnp.float32),
        "gln_gamma": jnp.ones((1, 1, KERNEL_SIZE * OFFSET_GROUPS), jnp.float32),
        "gln_beta": jnp.zeros((1, 1, KERNEL_SIZE * OFFSET_GROUPS), jnp.float32),
    }


def pack_params(params):
    """One-time repack into the kernel's (tap-major, lane-dense) layouts."""
    C, O, K = IN_CHANNELS, OUT_CHANNELS, KERNEL_SIZE
    return {
        "wmod": jnp.transpose(params["w_mod"], (2, 1, 0)).reshape(K * C, K),
        "wp": jnp.transpose(params["w_pconv"][:, :, 0], (1, 0)),          # (C, K)
        "alpha": jnp.asarray(params["prelu_alpha"], jnp.float32).reshape(1),
        "gamma": params["gln_gamma"].reshape(1, K),
        "beta": params["gln_beta"].reshape(1, K),
        "wflat": jnp.transpose(params["weight"], (2, 1, 0)).reshape(K * C, O),
        "bias": params["bias"][None, :],
    }


def packed_deformable_conv1d_forward(packed, x):
    """x: (B, C, L) float32 (NCL, like PyTorch). Returns (B, O, L)."""
    x_blc = jnp.transpose(x, (0, 2, 1))
    out_blo = fused_pallas_forward(x_blc, packed["wmod"], packed["wp"],
                                   packed["alpha"], packed["gamma"], packed["beta"],
                                   packed["wflat"], packed["bias"])
    return jnp.transpose(out_blo, (0, 2, 1))


# ------------------------- pure-JAX reference (check) ------------------------
def _conv1d_ncl(x, w):
    return lax.conv_general_dilated(x, w, window_strides=(1,), padding=[(0, 0)],
                                    dimension_numbers=("NCH", "OIH", "NCH"))


def _reference_forward(params, x):
    """Full forward in plain JAX (dense sampling-matrix formulation)."""
    B, C, L = x.shape
    K = KERNEL_SIZE
    # modulation conv + softmax over taps
    lm, rm = _same_pad_lr(K, 1)
    x_m = jnp.pad(x, ((0, 0), (0, 0), (lm, rm)), mode="reflect")
    m = jax.nn.softmax(_conv1d_ncl(x_m, params["w_mod"]), axis=1)           # (B, K, L)
    # offsets: pointwise conv -> PReLU -> GlobalLayerNorm
    p = jnp.einsum("oc,bcl->bol", params["w_pconv"][:, :, 0], x)            # (B, K, L)
    p = jnp.where(p >= 0, p, params["prelu_alpha"] * p)
    p_blc = jnp.transpose(p, (0, 2, 1))                                     # (B, L, K)
    mean = jnp.mean(p_blc, axis=(1, 2), keepdims=True)
    var = jnp.mean((p_blc - mean) ** 2, axis=(1, 2), keepdims=True)
    offsets = params["gln_gamma"] * (p_blc - mean) / jnp.sqrt(var + EPS) + params["gln_beta"]
    # deformable conv (dense G)
    ld, rd = _same_pad_lr(K, DILATION)
    x_pad_blc = jnp.transpose(jnp.pad(x, ((0, 0), (0, 0), (ld, rd)), mode="reflect"),
                              (0, 2, 1))                                    # (B, Lp, C)
    mask_blk = jnp.transpose(m, (0, 2, 1))                                  # (B, L, K)
    t0 = jnp.arange(L, dtype=jnp.float32)[:, None] * STRIDE
    dil = jnp.arange(K, dtype=jnp.float32) * DILATION
    T = t0[None] + dil[None, None, :] + offsets
    T = jnp.clip(T, t0[None], t0[None] + DILATION * (K - 1))
    pg = jnp.arange(x_pad_blc.shape[1], dtype=jnp.float32)
    G = jnp.maximum(0.0, 1.0 - jnp.abs(pg[None, None, None, :] - T[..., None]))
    y = jnp.einsum("btkp,bpc->btkc", G, x_pad_blc)
    z = y * mask_blk[..., None]
    out = jnp.einsum("btkc,kco->bto", z, jnp.transpose(params["weight"], (2, 1, 0)))
    out = out + params["bias"][None, None, :]
    return jnp.transpose(out, (0, 2, 1))                                    # (B, O, L)


def _randomize_params(params, key):
    """Nonzero offset/modulation weights to exercise interpolation + clamping."""
    k1, k2, k3, k4 = jax.random.split(key, 4)
    C, K = IN_CHANNELS, KERNEL_SIZE
    p = dict(params)
    p["w_pconv"] = 0.5 * jax.random.normal(k1, (K * OFFSET_GROUPS, C, 1), jnp.float32)
    p["w_mod"] = 0.3 * jax.random.normal(k2, (K, C, K), jnp.float32)
    p["gln_gamma"] = 1.0 + 0.1 * jax.random.normal(k3, (1, 1, K * OFFSET_GROUPS), jnp.float32)
    p["gln_beta"] = 0.2 * jax.random.normal(k4, (1, 1, K * OFFSET_GROUPS), jnp.float32)
    p["prelu_alpha"] = jnp.full((1,), 0.1, jnp.float32)
    return p


# ----------------------------------- main -------------------------------------
if __name__ == "__main__":
    key = jax.random.PRNGKey(0)
    kx, kp, kr = jax.random.split(key, 3)
    x = jax.random.normal(kx, (BATCH, IN_CHANNELS, LENGTH), jnp.float32)

    # 1) module-default init (offset conv zero-init, modulation conv = 0.5)
    params = init_params(kp)
    out = packed_deformable_conv1d_forward(pack_params(params), x)
    out = jax.block_until_ready(out)
    assert out.shape == (BATCH, OUT_CHANNELS, LENGTH), out.shape
    ref = _reference_forward(params, x)
    np.testing.assert_allclose(np.asarray(out), np.asarray(ref), rtol=1e-4, atol=1e-4)

    # 2) randomized params -> nonzero offsets exercise the in-kernel
    #    interpolation, clamping, PReLU and gLN paths.
    params_r = _randomize_params(params, kr)
    out_r = packed_deformable_conv1d_forward(pack_params(params_r), x)
    out_r = jax.block_until_ready(out_r)
    assert out_r.shape == (BATCH, OUT_CHANNELS, LENGTH), out_r.shape
    ref_r = _reference_forward(params_r, x)
    np.testing.assert_allclose(np.asarray(out_r), np.asarray(ref_r), rtol=1e-4, atol=1e-4)

    print("KERNEL_OK")
</pallas_src>

<mosaic_0001>
module attributes {stable_mosaic.version = 11 : i64} {
  func.func @kernel(%arg0: memref<2x16x8xf32, #tpu.memory_space<vmem>>, %arg1: memref<24x3xf32, #tpu.memory_space<vmem>>, %arg2: memref<8x3xf32, #tpu.memory_space<vmem>>, %arg3: memref<1xf32, #tpu.memory_space<smem>>, %arg4: memref<1x3xf32, #tpu.memory_space<vmem>>, %arg5: memref<1x3xf32, #tpu.memory_space<vmem>>, %arg6: memref<24x8xf32, #tpu.memory_space<vmem>>, %arg7: memref<1x8xf32, #tpu.memory_space<vmem>>, %arg8: memref<2x16x8xf32, #tpu.memory_space<vmem>>) attributes {dimension_semantics = [], scalar_prefetch = 0 : i64, scratch_operands = 0 : i64, tpu.core_type = #tpu.core_type<tc>} {
    %c0 = arith.constant 0 : index
    %c0_0 = arith.constant 0 : index
    %c0_1 = arith.constant 0 : index
    %0 = vector.load %arg0[%c0, %c0_0, %c0_1] : memref<2x16x8xf32, #tpu.memory_space<vmem>>, vector<2x16x8xf32>
    %1 = vector.extract_strided_slice %0 {offsets = [0, 1, 0], sizes = [2, 1, 8], strides = [1, 1, 1]} : vector<2x16x8xf32> to vector<2x1x8xf32>
    %2 = vector.extract_strided_slice %0 {offsets = [0, 14, 0], sizes = [2, 1, 8], strides = [1, 1, 1]} : vector<2x16x8xf32> to vector<2x1x8xf32>
    %3 = tpu.concatenate %1, %0, %2 in 1 : vector<2x1x8xf32>, vector<2x16x8xf32>, vector<2x1x8xf32> -> vector<2x18x8xf32>
    %4 = vector.extract_strided_slice %3 {offsets = [0, 0, 0], sizes = [2, 16, 8], strides = [1, 1, 1]} : vector<2x18x8xf32> to vector<2x16x8xf32>
    %5 = vector.extract_strided_slice %3 {offsets = [0, 1, 0], sizes = [2, 16, 8], strides = [1, 1, 1]} : vector<2x18x8xf32> to vector<2x16x8xf32>
    %6 = vector.extract_strided_slice %3 {offsets = [0, 2, 0], sizes = [2, 16, 8], strides = [1, 1, 1]} : vector<2x18x8xf32> to vector<2x16x8xf32>
    %7 = tpu.concatenate %4, %5, %6 in 2 : vector<2x16x8xf32>, vector<2x16x8xf32>, vector<2x16x8xf32> -> vector<2x16x24xf32>
    %8 = vector.shape_cast %7 : vector<2x16x24xf32> to vector<32x24xf32>
    %c0_2 = arith.constant 0 : index
    %c0_3 = arith.constant 0 : index
    %9 = vector.load %arg1[%c0_2, %c0_3] : memref<24x3xf32, #tpu.memory_space<vmem>>, vector<24x3xf32>
    %cst = arith.constant dense<0.000000e+00> : vector<32x3xf32>
    %10 = tpu.matmul %8, %9, %cst {dimension_numbers = #tpu.dot_dimension_numbers<[1], [0], [0], [1], [0, 0, 1, 1], [], []>} : vector<32x24xf32>, vector<24x3xf32>, vector<32x3xf32> -> vector<32x3xf32>
    %cst_4 = arith.constant dense<0xFF800000> : vector<32xf32>
    %11 = vector.multi_reduction <maximumf>, %10, %cst_4 [1] : vector<32x3xf32> to vector<32xf32>
    %12 = vector.shape_cast %11 : vector<32xf32> to vector<32x1xf32>
    %13 = vector.broadcast %12 : vector<32x1xf32> to vector<32x3xf32>
    %14 = arith.subf %10, %13 : vector<32x3xf32>
    %15 = math.exp %14 : vector<32x3xf32>
    %cst_5 = arith.constant dense<0.000000e+00> : vector<32xf32>
    %16 = vector.multi_reduction <add>, %15, %cst_5 [1] : vector<32x3xf32> to vector<32xf32>
    %17 = vector.shape_cast %16 : vector<32xf32> to vector<32x1xf32>
    %18 = vector.broadcast %17 : vector<32x1xf32> to vector<32x3xf32>
    %19 = arith.divf %15, %18 : vector<32x3xf32>
    %20 = vector.shape_cast %19 : vector<32x3xf32> to vector<2x16x3xf32>
    %21 = vector.shape_cast %0 : vector<2x16x8xf32> to vector<32x8xf32>
    %c0_6 = arith.constant 0 : index
    %c0_7 = arith.constant 0 : index
    %22 = vector.load %arg2[%c0_6, %c0_7] : memref<8x3xf32, #tpu.memory_space<vmem>>, vector<8x3xf32>
    %cst_8 = arith.constant dense<0.000000e+00> : vector<32x3xf32>
    %23 = tpu.matmul %21, %22, %cst_8 {dimension_numbers = #tpu.dot_dimension_numbers<[1], [0], [0], [1], [0, 0, 1, 1], [], []>} : vector<32x8xf32>, vector<8x3xf32>, vector<32x3xf32> -> vector<32x3xf32>
    %c0_9 = arith.constant 0 : index
    %24 = memref.load %arg3[%c0_9] : memref<1xf32, #tpu.memory_space<smem>>
    %cst_10 = arith.constant 0.000000e+00 : f32
    %25 = vector.broadcast %cst_10 : f32 to vector<32x3xf32>
    %26 = arith.cmpf oge, %23, %25 : vector<32x3xf32>
    %27 = vector.broadcast %24 : f32 to vector<32x3xf32>
    %28 = arith.mulf %27, %23 : vector<32x3xf32>
    %29 = arith.select %26, %23, %28 : vector<32x3xi1>, vector<32x3xf32>
    %30 = vector.shape_cast %29 : vector<32x3xf32> to vector<2x16x3xf32>
    %cst_11 = arith.constant dense<0.000000e+00> : vector<2x16xf32>
    %31 = vector.multi_reduction <add>, %30, %cst_11 [2] : vector<2x16x3xf32> to vector<2x16xf32>
    %32 = vector.shape_cast %31 : vector<2x16xf32> to vector<2x16x1xf32>
    %cst_12 = arith.constant dense<0.000000e+00> : vector<2x1xf32>
    %33 = vector.multi_reduction <add>, %32, %cst_12 [1] : vector<2x16x1xf32> to vector<2x1xf32>
    %34 = vector.shape_cast %33 : vector<2x1xf32> to vector<2x1x1xf32>
    %cst_13 = arith.constant 0.020833334 : f32
    %35 = vector.broadcast %cst_13 : f32 to vector<2x1x1xf32>
    %36 = arith.mulf %34, %35 : vector<2x1x1xf32>
    %37 = vector.broadcast %36 : vector<2x1x1xf32> to vector<2x16x3xf32>
    %38 = arith.subf %30, %37 : vector<2x16x3xf32>
    %39 = arith.mulf %38, %38 : vector<2x16x3xf32>
    %cst_14 = arith.constant dense<0.000000e+00> : vector<2x16xf32>
    %40 = vector.multi_reduction <add>, %39, %cst_14 [2] : vector<2x16x3xf32> to vector<2x16xf32>
    %41 = vector.shape_cast %40 : vector<2x16xf32> to vector<2x16x1xf32>
    %cst_15 = arith.constant dense<0.000000e+00> : vector<2x1xf32>
    %42 = vector.multi_reduction <add>, %41, %cst_15 [1] : vector<2x16x1xf32> to vector<2x1xf32>
    %43 = vector.shape_cast %42 : vector<2x1xf32> to vector<2x1x1xf32>
    %cst_16 = arith.constant 0.020833334 : f32
    %44 = vector.broadcast %cst_16 : f32 to vector<2x1x1xf32>
    %45 = arith.mulf %43, %44 : vector<2x1x1xf32>
    %c0_17 = arith.constant 0 : index
    %c0_18 = arith.constant 0 : index
    %46 = vector.load %arg4[%c0_17, %c0_18] : memref<1x3xf32, #tpu.memory_space<vmem>>, vector<1x3xf32>
    %47 = vector.shape_cast %46 : vector<1x3xf32> to vector<1x1x3xf32>
    %48 = vector.broadcast %47 : vector<1x1x3xf32> to vector<2x16x3xf32>
    %49 = arith.mulf %48, %38 : vector<2x16x3xf32>
    %cst_19 = arith.constant 9.99999971E-10 : f32
    %50 = vector.broadcast %cst_19 : f32 to vector<2x1x1xf32>
    %51 = arith.addf %45, %50 : vector<2x1x1xf32>
    %52 = math.sqrt %51 : vector<2x1x1xf32>
    %53 = vector.broadcast %52 : vector<2x1x1xf32> to vector<2x16x3xf32>
    %54 = arith.divf %49, %53 : vector<2x16x3xf32>
    %c0_20 = arith.constant 0 : index
    %c0_21 = arith.constant 0 : index
    %55 = vector.load %arg5[%c0_20, %c0_21] : memref<1x3xf32, #tpu.memory_space<vmem>>, vector<1x3xf32>
    %56 = vector.shape_cast %55 : vector<1x3xf32> to vector<1x1x3xf32>
    %57 = vector.broadcast %56 : vector<1x1x3xf32> to vector<2x16x3xf32>
    %58 = arith.addf %54, %57 : vector<2x16x3xf32>
    %59 = vector.extract_strided_slice %58 {offsets = [0, 0, 0], sizes = [2, 16, 1], strides = [1, 1, 1]} : vector<2x16x3xf32> to vector<2x16x1xf32>
    %cst_22 = arith.constant 0.000000e+00 : f32
    %60 = vector.broadcast %cst_22 : f32 to vector<2x16x1xf32>
    %61 = arith.addf %59, %60 : vector<2x16x1xf32>
    %cst_23 = arith.constant 0.000000e+00 : f32
    %cst_24 = arith.constant 2.000000e+00 : f32
    %62 = vector.broadcast %cst_23 : f32 to vector<2x16x1xf32>
    %63 = arith.maximumf %62, %61 : vector<2x16x1xf32>
    %64 = vector.broadcast %cst_24 : f32 to vector<2x16x1xf32>
    %65 = arith.minimumf %64, %63 : vector<2x16x1xf32>
    %66 = math.absf %65 : vector<2x16x1xf32>
    %cst_25 = arith.constant 1.000000e+00 : f32
    %67 = vector.broadcast %cst_25 : f32 to vector<2x16x1xf32>
    %68 = arith.subf %67, %66 : vector<2x16x1xf32>
    %cst_26 = arith.constant 0.000000e+00 : f32
    %69 = vector.broadcast %cst_26 : f32 to vector<2x16x1xf32>
    %70 = arith.maximumf %69, %68 : vector<2x16x1xf32>
    %71 = vector.broadcast %70 : vector<2x16x1xf32> to vector<2x16x8xf32>
    %72 = arith.mulf %71, %4 : vector<2x16x8xf32>
    %cst_27 = arith.constant 1.000000e+00 : f32
    %73 = vector.broadcast %cst_27 : f32 to vector<2x16x1xf32>
    %74 = arith.subf %65, %73 : vector<2x16x1xf32>
    %75 = math.absf %74 : vector<2x16x1xf32>
    %cst_28 = arith.constant 1.000000e+00 : f32
    %76 = vector.broadcast %cst_28 : f32 to vector<2x16x1xf32>
    %77 = arith.subf %76, %75 : vector<2x16x1xf32>
    %cst_29 = arith.constant 0.000000e+00 : f32
    %78 = vector.broadcast %cst_29 : f32 to vector<2x16x1xf32>
    %79 = arith.maximumf %78, %77 : vector<2x16x1xf32>
    %80 = vector.broadcast %79 : vector<2x16x1xf32> to vector<2x16x8xf32>
    %81 = arith.mulf %80, %5 : vector<2x16x8xf32>
    %82 = arith.addf %72, %81 : vector<2x16x8xf32>
    %cst_30 = arith.constant 2.000000e+00 : f32
    %83 = vector.broadcast %cst_30 : f32 to vector<2x16x1xf32>
    %84 = arith.subf %65, %83 : vector<2x16x1xf32>
    %85 = math.absf %84 : vector<2x16x1xf32>
    %cst_31 = arith.constant 1.000000e+00 : f32
    %86 = vector.broadcast %cst_31 : f32 to vector<2x16x1xf32>
    %87 = arith.subf %86, %85 : vector<2x16x1xf32>
    %cst_32 = arith.constant 0.000000e+00 : f32
    %88 = vector.broadcast %cst_32 : f32 to vector<2x16x1xf32>
    %89 = arith.maximumf %88, %87 : vector<2x16x1xf32>
    %90 = vector.broadcast %89 : vector<2x16x1xf32> to vector<2x16x8xf32>
    %91 = arith.mulf %90, %6 : vector<2x16x8xf32>
    %92 = arith.addf %82, %91 : vector<2x16x8xf32>
    %93 = vector.extract_strided_slice %20 {offsets = [0, 0, 0], sizes = [2, 16, 1], strides = [1, 1, 1]} : vector<2x16x3xf32> to vector<2x16x1xf32>
    %94 = vector.broadcast %93 : vector<2x16x1xf32> to vector<2x16x8xf32>
    %95 = arith.mulf %92, %94 : vector<2x16x8xf32>
    %96 = vector.extract_strided_slice %58 {offsets = [0, 0, 1], sizes = [2, 16, 1], strides = [1, 1, 1]} : vector<2x16x3xf32> to vector<2x16x1xf32>
    %cst_33 = arith.constant 1.000000e+00 : f32
    %97 = vector.broadcast %cst_33 : f32 to vector<2x16x1xf32>
    %98 = arith.addf %96, %97 : vector<2x16x1xf32>
    %cst_34 = arith.constant 0.000000e+00 : f32
    %cst_35 = arith.constant 2.000000e+00 : f32
    %99 = vector.broadcast %cst_34 : f32 to vector<2x16x1xf32>
    %100 = arith.maximumf %99, %98 : vector<2x16x1xf32>
    %101 = vector.broadcast %cst_35 : f32 to vector<2x16x1xf32>
    %102 = arith.minimumf %101, %100 : vector<2x16x1xf32>
    %103 = math.absf %102 : vector<2x16x1xf32>
    %cst_36 = arith.constant 1.000000e+00 : f32
    %104 = vector.broadcast %cst_36 : f32 to vector<2x16x1xf32>
    %105 = arith.subf %104, %103 : vector<2x16x1xf32>
    %cst_37 = arith.constant 0.000000e+00 : f32
    %106 = vector.broadcast %cst_37 : f32 to vector<2x16x1xf32>
    %107 = arith.maximumf %106, %105 : vector<2x16x1xf32>
    %108 = vector.broadcast %107 : vector<2x16x1xf32> to vector<2x16x8xf32>
    %109 = arith.mulf %108, %4 : vector<2x16x8xf32>
    %cst_38 = arith.constant 1.000000e+00 : f32
    %110 = vector.broadcast %cst_38 : f32 to vector<2x16x1xf32>
    %111 = arith.subf %102, %110 : vector<2x16x1xf32>
    %112 = math.absf %111 : vector<2x16x1xf32>
    %cst_39 = arith.constant 1.000000e+00 : f32
    %113 = vector.broadcast %cst_39 : f32 to vector<2x16x1xf32>
    %114 = arith.subf %113, %112 : vector<2x16x1xf32>
    %cst_40 = arith.constant 0.000000e+00 : f32
    %115 = vector.broadcast %cst_40 : f32 to vector<2x16x1xf32>
    %116 = arith.maximumf %115, %114 : vector<2x16x1xf32>
    %117 = vector.broadcast %116 : vector<2x16x1xf32> to vector<2x16x8xf32>
    %118 = arith.mulf %117, %5 : vector<2x16x8xf32>
    %119 = arith.addf %109, %118 : vector<2x16x8xf32>
    %cst_41 = arith.constant 2.000000e+00 : f32
    %120 = vector.broadcast %cst_41 : f32 to vector<2x16x1xf32>
    %121 = arith.subf %102, %120 : vector<2x16x1xf32>
    %122 = math.absf %121 : vector<2x16x1xf32>
    %cst_42 = arith.constant 1.000000e+00 : f32
    %123 = vector.broadcast %cst_42 : f32 to vector<2x16x1xf32>
    %124 = arith.subf %123, %122 : vector<2x16x1xf32>
    %cst_43 = arith.constant 0.000000e+00 : f32
    %125 = vector.broadcast %cst_43 : f32 to vector<2x16x1xf32>
    %126 = arith.maximumf %125, %124 : vector<2x16x1xf32>
    %127 = vector.broadcast %126 : vector<2x16x1xf32> to vector<2x16x8xf32>
    %128 = arith.mulf %127, %6 : vector<2x16x8xf32>
    %129 = arith.addf %119, %128 : vector<2x16x8xf32>
    %130 = vector.extract_strided_slice %20 {offsets = [0, 0, 1], sizes = [2, 16, 1], strides = [1, 1, 1]} : vector<2x16x3xf32> to vector<2x16x1xf32>
    %131 = vector.broadcast %130 : vector<2x16x1xf32> to vector<2x16x8xf32>
    %132 = arith.mulf %129, %131 : vector<2x16x8xf32>
    %133 = vector.extract_strided_slice %58 {offsets = [0, 0, 2], sizes = [2, 16, 1], strides = [1, 1, 1]} : vector<2x16x3xf32> to vector<2x16x1xf32>
    %cst_44 = arith.constant 2.000000e+00 : f32
    %134 = vector.broadcast %cst_44 : f32 to vector<2x16x1xf32>
    %135 = arith.addf %133, %134 : vector<2x16x1xf32>
    %cst_45 = arith.constant 0.000000e+00 : f32
    %cst_46 = arith.constant 2.000000e+00 : f32
    %136 = vector.broadcast %cst_45 : f32 to vector<2x16x1xf32>
    %137 = arith.maximumf %136, %135 : vector<2x16x1xf32>
    %138 = vector.broadcast %cst_46 : f32 to vector<2x16x1xf32>
    %139 = arith.minimumf %138, %137 : vector<2x16x1xf32>
    %140 = math.absf %139 : vector<2x16x1xf32>
    %cst_47 = arith.constant 1.000000e+00 : f32
    %141 = vector.broadcast %cst_47 : f32 to vector<2x16x1xf32>
    %142 = arith.subf %141, %140 : vector<2x16x1xf32>
    %cst_48 = arith.constant 0.000000e+00 : f32
    %143 = vector.broadcast %cst_48 : f32 to vector<2x16x1xf32>
    %144 = arith.maximumf %143, %142 : vector<2x16x1xf32>
    %145 = vector.broadcast %144 : vector<2x16x1xf32> to vector<2x16x8xf32>
    %146 = arith.mulf %145, %4 : vector<2x16x8xf32>
    %cst_49 = arith.constant 1.000000e+00 : f32
    %147 = vector.broadcast %cst_49 : f32 to vector<2x16x1xf32>
    %148 = arith.subf %139, %147 : vector<2x16x1xf32>
    %149 = math.absf %148 : vector<2x16x1xf32>
    %cst_50 = arith.constant 1.000000e+00 : f32
    %150 = vector.broadcast %cst_50 : f32 to vector<2x16x1xf32>
    %151 = arith.subf %150, %149 : vector<2x16x1xf32>
    %cst_51 = arith.constant 0.000000e+00 : f32
    %152 = vector.broadcast %cst_51 : f32 to vector<2x16x1xf32>
    %153 = arith.maximumf %152, %151 : vector<2x16x1xf32>
    %154 = vector.broadcast %153 : vector<2x16x1xf32> to vector<2x16x8xf32>
    %155 = arith.mulf %154, %5 : vector<2x16x8xf32>
    %156 = arith.addf %146, %155 : vector<2x16x8xf32>
    %cst_52 = arith.constant 2.000000e+00 : f32
    %157 = vector.broadcast %cst_52 : f32 to vector<2x16x1xf32>
    %158 = arith.subf %139, %157 : vector<2x16x1xf32>
    %159 = math.absf %158 : vector<2x16x1xf32>
    %cst_53 = arith.constant 1.000000e+00 : f32
    %160 = vector.broadcast %cst_53 : f32 to vector<2x16x1xf32>
    %161 = arith.subf %160, %159 : vector<2x16x1xf32>
    %cst_54 = arith.constant 0.000000e+00 : f32
    %162 = vector.broadcast %cst_54 : f32 to vector<2x16x1xf32>
    %163 = arith.maximumf %162, %161 : vector<2x16x1xf32>
    %164 = vector.broadcast %163 : vector<2x16x1xf32> to vector<2x16x8xf32>
    %165 = arith.mulf %164, %6 : vector<2x16x8xf32>
    %166 = arith.addf %156, %165 : vector<2x16x8xf32>
    %167 = vector.extract_strided_slice %20 {offsets = [0, 0, 2], sizes = [2, 16, 1], strides = [1, 1, 1]} : vector<2x16x3xf32> to vector<2x16x1xf32>
    %168 = vector.broadcast %167 : vector<2x16x1xf32> to vector<2x16x8xf32>
    %169 = arith.mulf %166, %168 : vector<2x16x8xf32>
    %170 = tpu.concatenate %95, %132, %169 in 2 : vector<2x16x8xf32>, vector<2x16x8xf32>, vector<2x16x8xf32> -> vector<2x16x24xf32>
    %171 = vector.shape_cast %170 : vector<2x16x24xf32> to vector<32x24xf32>
    %c0_55 = arith.constant 0 : index
    %c0_56 = arith.constant 0 : index
    %172 = vector.load %arg6[%c0_55, %c0_56] : memref<24x8xf32, #tpu.memory_space<vmem>>, vector<24x8xf32>
    %cst_57 = arith.constant dense<0.000000e+00> : vector<32x8xf32>
    %173 = tpu.matmul %171, %172, %cst_57 {dimension_numbers = #tpu.dot_dimension_numbers<[1], [0], [0], [1], [0, 0, 1, 1], [], []>} : vector<32x24xf32>, vector<24x8xf32>, vector<32x8xf32> -> vector<32x8xf32>
    %c0_58 = arith.constant 0 : index
    %c0_59 = arith.constant 0 : index
    %174 = vector.load %arg7[%c0_58, %c0_59] : memref<1x8xf32, #tpu.memory_space<vmem>>, vector<1x8xf32>
    %175 = vector.broadcast %174 : vector<1x8xf32> to vector<32x8xf32>
    %176 = arith.addf %173, %175 : vector<32x8xf32>
    %177 = vector.shape_cast %176 : vector<32x8xf32> to vector<2x16x8xf32>
    %c0_60 = arith.constant 0 : index
    %c0_61 = arith.constant 0 : index
    %c0_62 = arith.constant 0 : index
    %178 = vector.load %arg8[%c0_60, %c0_61, %c0_62] : memref<2x16x8xf32, #tpu.memory_space<vmem>>, vector<2x16x8xf32>
    tpu.vector_store %arg8[%c0_60, %c0_61, %c0_62], %177 {strides = array<i32>} : memref<2x16x8xf32, #tpu.memory_space<vmem>>, vector<2x16x8xf32>,
    return
  }
}

</mosaic_0001>

<bundles_post_ra>
// kernel: tpu_custom_call.1
= control target key start
LH: loop header
LB: loop body
LE: loop exit
PB: predicated region body
PF: predicated region fallthrough
CT: control target
= control target key end

     0   :  { %vm113_vm0 = vcmask 64512   ;;  %vm42_vm1 = vcmask 1040384   ;;  %vm67_vm2 = vcmask 1046528   ;;  %vm90_vm3 = vcmask 1045504   ;;  %s1271_s19 = smov 8   ;;  %s1272_s20 = smov 16   ;;  %s1668_s2 = inlined_call_operand.vmem [shape: f32[8,3], index: 2, kind: input, shape index: {}]   ;;  %s1669_s0 = inlined_call_operand.vmem [shape: f32[2,16,8], index: 0, kind: input, shape index: {}]   ;;  %s1670_s1 = inlined_call_operand.vmem [shape: f32[24,3], index: 1, kind: input, shape index: {}]   ;;  %s1671_s3 = inlined_call_operand.<no memory space> [shape: f32[1], index: 3, kind: input, shape index: {}]   ;;  %s1672_s4 = inlined_call_operand.vmem [shape: f32[1,3], index: 4, kind: input, shape index: {}]   ;;  %s1673_s5 = inlined_call_operand.vmem [shape: f32[1,3], index: 5, kind: input, shape index: {}]   ;;  %s1674_s6 = inlined_call_operand.vmem [shape: f32[24,8], index: 6, kind: input, shape index: {}]   ;;  %s1675_s7 = inlined_call_operand.vmem [shape: f32[1,8], index: 7, kind: input, shape index: {}]   ;;  %s1676_s8 = inlined_call_operand.vmem [shape: f32[2,16,8], index: 8, kind: output, shape index: {}]  }
   0x1   :  { %v269_v0 = vld [vmem:[%s1668_s2] sm:$0xff]  ;;  %v31_v2 = vld [vmem:[%s1669_s0 + $0x8] sm:$0xff]  ;;  %v32_v7 = vld [vmem:[%s1669_s0 + $0x10] sm:$0xff]  ;;  %vm118_vm4 = vcmask 130048   ;;  %vm126_vm5 = vcmask 195584   ;;  %v368_v59 = vstv %s1671_s3  ;;  %vm224_vm7 = vcmask 23552  }
   0x2   :  { %v30_v1 = vld [vmem:[%s1669_s0] sm:$0xff]  ;;  %1190 = vmatprep.subr.mxu1 %v269_v0  ;;  %v44_v5 = vrot.slane %v31_v2, 7  ;;  %v55_v6 = vrot.slane %v31_v2, 5  ;;  %v33_v8 = vld [vmem:[%s1669_s0 + $0x18] sm:$0xff]  ;;  %v37_v9 = vrot.slane %v32_v7, 1  ;;  %v46_v10 = vrot.slane %v32_v7, 7 }
   0x3   :  { %v36_v3 = vrot.slane %v30_v1, 1  ;;  %v43_v4 = vrot.slane %v30_v1, 7  ;;  %1192 = vmatprep.mubr.msk.f32.mxu1 %vm113_vm0, %v30_v1  ;;  %1191 = vmatpush3.msra.mxu1 %v269_v0  ;;  %v47_v11 = vrot.slane %v33_v8, 7  ;;  %v56_v12 = vrot.slane %v33_v8, 5  ;;  %v123_v13 = vld [vmem:[%s1670_s1] sm:$0xff]  ;;  %v124_v14 = vld [vmem:[%s1670_s1 + $0x8] sm:$0xff] }
   0x4   :  { %1193 = vmatmul.mubr.msk.f32.vlgmr.msra.gmra.mrb[0].mxu1 %vm113_vm0, %v31_v2  ;;  %v61_v17 = vsel %vm42_vm1, %v44_v5, %v55_v6  ;;  %v1210_v18 = vpack.c.bf16 %v124_v14, %v123_v13  ;;  %v1352_v19 = vsel %vm42_vm1, %v37_v9, %v46_v10  ;;  %v125_v27 = vld [vmem:[%s1670_s1 + $0x10] sm:$0xff] }
   0x5   :  { %v1344_v15 = vsel %vm42_vm1, %v36_v3, %v43_v4  ;;  %v1347_v16 = vsel %vm42_vm1, %v43_v4, %v44_v5  ;;  %1195 = vmatprep.mubr.msk.f32.mxu1 %vm113_vm0, %v32_v7  ;;  %v1356_v20 = vsel %vm42_vm1, %v46_v10, %v47_v11  ;;  %v71_v25 = vrot.slane %v61_v17, 1 }
   0x6   :  { %v68_v21 = vrot.slane %v1344_v15, 1  ;;  %v69_v22 = vrot.slane %v1347_v16, 1  ;;  %v91_v23 = vrot.slane %v1344_v15, 2  ;;  %v92_v24 = vrot.slane %v1347_v16, 2  ;;  %1211 = vmatprep.subr.bf16.mxu0 %v1210_v18 }
   0x7   :  { %v94_v26 = vrot.slane %v61_v17, 2  ;;  %v62_v29 = vsel %vm42_vm1, %v47_v11, %v56_v12  ;;  %1213 = vmatpush3.bf16.msra.mxu0 %v1210_v18  ;;  %v73_v32 = vrot.slane %v1352_v19, 1  ;;  %v74_v33 = vrot.slane %v1356_v20, 1 }
   0x8   :  { %v1366_v28 = vsel %vm67_vm2, %v68_v21, %v69_v22  ;;  %1196 = vmatmul.mubr.msk.f32.gmra.mrb[2].mxu1 %vm113_vm0, %v33_v8  ;;  %v1373_v30 = vsel %vm90_vm3, %v91_v23, %v92_v24  ;;  %v1378_v31 = vsel %vm67_vm2, %v69_v22, %v71_v25  ;;  %1182 = vmatprep.subr.mxu0 %v125_v27  ;;  %v76_v35 = vrot.slane %v62_v29, 1 }
   0x9   :  { %78 = vrot.lane.b32.xlu0 %v1366_v28, %s1271_s19  ;;  %101 = vrot.lane.b32.xlu1 %v1373_v30, %s1272_s20  ;;  %v1383_v34 = vsel %vm90_vm3, %v92_v24, %v94_v26  ;;  %v1390_v36 = vsel %vm67_vm2, %v73_v32, %v74_v33  ;;  %v96_v37 = vrot.slane %v1352_v19, 2  ;;  %v97_v38 = vrot.slane %v1356_v20, 2 }
   0xa   :  { %v1395_v39 = vsel %vm67_vm2, %v74_v33, %v76_v35  ;;  %v99_v40 = vrot.slane %v62_v29, 2 }
   0xb   :  { %1183 = vmatpush3.msra.mxu0 %v125_v27  ;;  %v1402_v41 = vsel %vm90_vm3, %v96_v37, %v97_v38 }
   0xc   :  { %v1405_v42 = vsel %vm90_vm3, %v97_v38, %v99_v40 }
   0xd   :  { %80 = vrot.lane.b32.xlu0 %v1378_v31, %s1271_s19  ;;  %103 = vrot.lane.b32.xlu1 %v1383_v34, %s1272_s20 }
  0x11   :  { %82 = vrot.lane.b32.xlu0 %v1390_v36, %s1271_s19  ;;  %84 = vrot.lane.b32.xlu1 %v1395_v39, %s1271_s19 }
  0x15   :  { %105 = vrot.lane.b32.xlu0 %v1402_v41, %s1272_s20  ;;  %107 = vrot.lane.b32.xlu1 %v1405_v42, %s1272_s20 }
  0x7b   :  { %v79_v43 = vpop.permute.xlu0 %78  ;;  %v102_v45 = vpop.permute.xlu1 %101 }
  0x7c   :  { %v114_v44 = vsel %vm113_vm0, %v1344_v15, %v79_v43 }
  0x7d   :  { %v119_v46 = vsel %vm118_vm4, %v114_v44, %v102_v45 }
  0x7e   :  { %1184 = vmatprep.mubr.msk.f32.mxu0 %vm126_vm5, %v119_v46 }
  0x7f   :  { %v81_v47 = vpop.permute.xlu0 %80  ;;  %v104_v49 = vpop.permute.xlu1 %103 }
  0x80   :  { %v115_v48 = vsel %vm113_vm0, %v1347_v16, %v81_v47 }
  0x81   :  { %v120_v50 = vsel %vm118_vm4, %v115_v48, %v104_v49 }
  0x82   :  { %1185 = vmatmul.mubr.msk.f32.vlgmr.msra.gmra.mrb[0].mxu0 %vm126_vm5, %v120_v50 }
  0x83   :  { %v83_v51 = vpop.permute.xlu0 %82  ;;  %v85_v52 = vpop.permute.xlu1 %84 }
  0x84   :  { %v116_v53 = vsel %vm113_vm0, %v1352_v19, %v83_v51  ;;  %v117_v54 = vsel %vm113_vm0, %v1356_v20, %v85_v52 }
  0x87   :  { %v106_v55 = vpop.permute.xlu0 %105  ;;  %v108_v57 = vpop.permute.xlu1 %107 }
  0x88   :  { %v121_v56 = vsel %vm118_vm4, %v116_v53, %v106_v55  ;;  %v122_v58 = vsel %vm118_vm4, %v117_v54, %v108_v57 }
  0x89   :  { %1187 = vmatprep.mubr.msk.f32.mxu0 %vm126_vm5, %v121_v56 }
  0x8a   :  { %1188 = vmatmul.mubr.msk.f32.gmra.mrb[2].mxu0 %vm126_vm5, %v122_v58 }
  0xd7   :  { %v1194_v60 = vpop.f32.mrb[0].mxu1 }
  0xd8   :  { %vm365_vm6 = vcmp.ge.f32.partialorder %v1194_v60, 0.0  ;;  %v370_v61 = vmul.f32 %v1194_v60, %v368_v59  ;;  %v344_v62 = vpop.f32.mrb[1].mxu1 }
  0xd9   :  { %vm364_vm8 = vcmp.ge.f32.partialorder %v344_v62, 0.0  ;;  %v369_v63 = vmul.f32 %v368_v59, %v344_v62 }
  0xda   :  { %v374_v0 = vsel %vm365_vm6, %v1194_v60, %v370_v61 }
  0xdb   :  { %v1197_v1 = vpop.f32.mrb[2].mxu1  ;;  %v380_v2 = vsel %vm224_vm7, %v374_v0, 0.0  ;;  %v373_v3 = vsel %vm364_vm8, %v344_v62, %v369_v63 }
  0xdc   :  { %vm367_vm9 = vcmp.ge.f32.partialorder %v1197_v1, 0.0  ;;  %v372_v4 = vmul.f32 %v1197_v1, %v368_v59  ;;  %v354_v5 = vpop.f32.mrb[3].mxu1  ;;  %381 = vadd.xlane.f32.xlu1 %v380_v2  ;;  %v377_v6 = vsel %vm224_vm7, %v373_v3, 0.0 }
  0xdd   :  { %vm366_vm10 = vcmp.ge.f32.partialorder %v354_v5, 0.0  ;;  %v371_v7 = vmul.f32 %v368_v59, %v354_v5  ;;  %378 = vadd.xlane.f32.xlu0 %v377_v6 }
  0xde   :  { %v376_v9 = vsel %vm367_vm9, %v1197_v1, %v372_v4 }
  0xdf   :  { %v375_v8 = vsel %vm366_vm10, %v354_v5, %v371_v7  ;;  %v386_v11 = vsel %vm224_vm7, %v376_v9, 0.0 }
  0xe0   :  { %v383_v10 = vsel %vm224_vm7, %v375_v8, 0.0 }
  0xe1   :  { %384 = vadd.xlane.f32.xlu0 %v383_v10 }
  0xe5   :  { %387 = vadd.xlane.f32.xlu0 %v386_v11 }
 0x155   :  { %v1186_v12 = vpop.f32.mrb[0].mxu0 }
 0x156   :  { %v205_v13 = vpop.f32.mrb[1].mxu0  ;;  %v228_v14 = vsel %vm224_vm7, %v1186_v12, -inf }
 0x157   :  { %229 = vmax.xlane.f32.xlu0 %v228_v14  ;;  %v225_v17 = vsel %vm224_vm7, %v205_v13, -inf }
 0x158   :  { %226 = vmax.xlane.f32.xlu1 %v225_v17 }
 0x15d   :  { %v1189_v18 = vpop.f32.mrb[2].mxu0 }
 0x15e   :  { %v215_v21 = vpop.f32.mrb[3].mxu0  ;;  %v234_v22 = vsel %vm224_vm7, %v1189_v18, -inf }
 0x15f   :  { %235 = vmax.xlane.f32.xlu0 %v234_v22  ;;  %v231_v23 = vsel %vm224_vm7, %v215_v21, -inf }
 0x160   :  { %232 = vmax.xlane.f32.xlu1 %v231_v23 }
 0x169   :  { %v382_v24 = vpop.xlane.xlu1 %381 }
 0x16a   :  { %v379_v25 = vpop.xlane.xlu0 %378 }
 0x16b   :  { %v389_v26 = vadd.f32 %v382_v24, %v379_v25 }
 0x16d   :  { %v390_v27 = vrot.slane %v389_v26, 4 }
 0x16e   :  { %v385_v29 = vpop.xlane.xlu0 %384 }
 0x16f   :  { %v391_v32 = vadd.f32 %v390_v27, %v389_v26 }
 0x171   :  { %v392_v33 = vrot.slane %v391_v32, 2 }
 0x172   :  { %v388_v35 = vpop.xlane.xlu0 %387 }
 0x173   :  { %v393_v37 = vadd.f32 %v392_v33, %v391_v32  ;;  %v396_v38 = vadd.f32 %v388_v35, %v385_v29 }
 0x175   :  { %v394_v40 = vrot.slane %v393_v37, 1  ;;  %v397_v43 = vrot.slane %v396_v38, 4 }
 0x177   :  { %v395_v44 = vadd.f32 %v394_v40, %v393_v37  ;;  %v398_v45 = vadd.f32 %v397_v43, %v396_v38 }
 0x179   :  { %v399_v46 = vrot.slane %v398_v45, 2  ;;  %v403_v47 = vmul.f32 0.020833334, %v395_v44 }
 0x17b   :  { %v400_v48 = vadd.f32 %v399_v46, %v398_v45  ;;  %v1438_v49 = vsub.f32 %v374_v0, %v403_v47  ;;  %v1440_v50 = vsub.f32 %v373_v3, %v403_v47  ;;  %v1273_v0 = vmov 1  }
 0x17c   :  { %1223 = vset.pattern.permute.xlu1 %v1273_v0  ;;  %1225 = vset.pattern.permute.xlu0 %v1273_v0 }
 0x17d   :  { %v401_v51 = vrot.slane %v400_v48, 1  ;;  %v410_v52 = vmul.f32 %v1438_v49, %v1438_v49  ;;  %v409_v53 = vmul.f32 %v1440_v50, %v1440_v50 }
 0x17f   :  { %v402_v54 = vadd.f32 %v401_v51, %v400_v48  ;;  %v416_v55 = vsel %vm224_vm7, %v410_v52, 0.0  ;;  %v413_v56 = vsel %vm224_vm7, %v409_v53, 0.0 }
 0x180   :  { %417 = vadd.xlane.f32.xlu0 %v416_v55  ;;  %414 = vadd.xlane.f32.xlu1 %v413_v56 }
 0x181   :  { %v404_v57 = vmul.f32 0.020833334, %v402_v54 }
 0x183   :  { %v1448_v58 = vsub.f32 %v376_v9, %v404_v57  ;;  %v1450_v59 = vsub.f32 %v375_v8, %v404_v57 }
 0x185   :  { %v412_v60 = vmul.f32 %v1448_v58, %v1448_v58  ;;  %v411_v61 = vmul.f32 %v1450_v59, %v1450_v59 }
 0x187   :  { %v422_v62 = vsel %vm224_vm7, %v412_v60, 0.0  ;;  %v419_v63 = vsel %vm224_vm7, %v411_v61, 0.0 }
 0x188   :  { %423 = vadd.xlane.f32.xlu0 %v422_v62  ;;  %420 = vadd.xlane.f32.xlu1 %v419_v63 }
 0x1e4   :  { %v230_v1 = vpop.xlane.xlu0 %229 }
 0x1e5   :  { %v238_v2 = vsub.f32 %v1186_v12, %v230_v1  ;;  %v227_v3 = vpop.xlane.xlu1 %226 }
 0x1e6   :  { %v237_v4 = vsub.f32 %v205_v13, %v227_v3  ;;  %v1128_v3 = vld [vmem:[%s1672_s4] ss:$0 sm:$0xff] }
 0x1e7   :  { %v243_v5 = vmul.f32 1.442695, %v238_v2 }
 0x1e8   :  { %v241_v6 = vmul.f32 1.442695, %v237_v4 }
 0x1e9   :  { %1247 = vpow2.f32 %v243_v5 }
 0x1ea   :  { %1249 = vpow2.f32 %v241_v6 }
 0x1ec   :  { %v236_v7 = vpop.xlane.xlu0 %235 }
 0x1ed   :  { %v240_v8 = vsub.f32 %v1189_v18, %v236_v7  ;;  %v233_v9 = vpop.xlane.xlu1 %232  ;;  %v449_v7 = vmul.f32 %v1128_v3, %v1438_v49 }
 0x1ee   :  { %v239_v10 = vsub.f32 %v215_v21, %v233_v9 }
 0x1ef   :  { %v247_v11 = vmul.f32 1.442695, %v240_v8  ;;  %v448_v8 = vmul.f32 %v1128_v3, %v1440_v50 }
 0x1f0   :  { %v245_v14 = vmul.f32 1.442695, %v239_v10  ;;  %v1129_v10 = vld [vmem:[%s1673_s5] ss:$0 sm:$0xff] }
 0x1f1   :  { %1251 = vpow2.f32 %v247_v11 }
 0x1f2   :  { %1253 = vpow2.f32 %v245_v14 }
 0x1f3   :  { %v1460_v17 = vpop.eup %1247 }
 0x1f4   :  { %v1462_v22 = vpop.eup %1249  ;;  %v252_v12 = vsel %vm224_vm7, %v1460_v17, 0.0 }
 0x1f5   :  { %253 = vadd.xlane.f32.xlu0 %v252_v12  ;;  %v249_v13 = vsel %vm224_vm7, %v1462_v22, 0.0 }
 0x1f6   :  { %250 = vadd.xlane.f32.xlu1 %v249_v13 }
 0x1fb   :  { %v1468_v23 = vpop.eup %1251 }
 0x1fc   :  { %v1470_v18 = vpop.eup %1253  ;;  %v258_v21 = vsel %vm224_vm7, %v1468_v23, 0.0 }
 0x1fd   :  { %259 = vadd.xlane.f32.xlu0 %v258_v21  ;;  %v255_v24 = vsel %vm224_vm7, %v1470_v18, 0.0 }
 0x1fe   :  { %256 = vadd.xlane.f32.xlu1 %v255_v24 }
 0x20d   :  { %v415_v25 = vpop.xlane.xlu1 %414  ;;  %v418_v26 = vpop.xlane.xlu0 %417 }
 0x20e   :  { %v425_v27 = vadd.f32 %v418_v26, %v415_v25 }
 0x210   :  { %v426_v29 = vrot.slane %v425_v27, 4 }
 0x212   :  { %v427_v32 = vadd.f32 %v426_v29, %v425_v27 }
 0x214   :  { %v428_v33 = vrot.slane %v427_v32, 2 }
 0x215   :  { %v421_v35 = vpop.xlane.xlu1 %420  ;;  %v424_v37 = vpop.xlane.xlu0 %423 }
 0x216   :  { %v429_v38 = vadd.f32 %v428_v33, %v427_v32  ;;  %v432_v40 = vadd.f32 %v424_v37, %v421_v35  ;;  %v451_v32 = vmul.f32 %v1128_v3, %v1448_v58 }
 0x218   :  { %v430_v43 = vrot.slane %v429_v38, 1  ;;  %v433_v44 = vrot.slane %v432_v40, 4 }
 0x21a   :  { %v431_v45 = vadd.f32 %v430_v43, %v429_v38  ;;  %v434_v46 = vadd.f32 %v433_v44, %v432_v40 }
 0x21c   :  { %v439_v47 = vmul.f32 0.020833334, %v431_v45  ;;  %v435_v48 = vrot.slane %v434_v46, 2 }
 0x21e   :  { %v452_v51 = vadd.f32 1e-09, %v439_v47  ;;  %v436_v52 = vadd.f32 %v435_v48, %v434_v46  ;;  %v450_v48 = vmul.f32 %v1128_v3, %v1450_v59 }
 0x220   :  { %1255 = vrsqrt.f32 %v452_v51  ;;  %v437_v53 = vrot.slane %v436_v52, 1  ;;  %vm456_vm11 = vcmp.eq.f32.partialorder %v452_v51, inf  ;;  %v459_v61 = vand.u32 2147483648, %v452_v51 }
 0x221   :  { %vm458_vm12 = vcmp.eq.f32.partialorder %v452_v51, 0.0 }
 0x222   :  { %v438_v54 = vadd.f32 %v437_v53, %v436_v52 }
 0x224   :  { %v440_v55 = vmul.f32 0.020833334, %v438_v54 }
 0x226   :  { %v453_v56 = vadd.f32 1e-09, %v440_v55 }
 0x228   :  { %1257 = vrsqrt.f32 %v453_v56  ;;  %vm463_vm13 = vcmp.eq.f32.partialorder %v453_v56, inf  ;;  %v466_v4 = vand.u32 2147483648, %v453_v56  ;;  %vm465_vm14 = vcmp.eq.f32.partialorder %v453_v56, 0.0 }
 0x22a   :  { %v1256_v57 = vpop.eup %1255 }
 0x22b   :  { %v455_v60 = vmul.f32 %v1256_v57, %v452_v51 }
 0x22d   :  { %v457_v62 = vsel %vm456_vm11, %v452_v51, %v455_v60 }
 0x22e   :  { %v460_v63 = vsel %vm458_vm12, %v459_v61, %v457_v62 }
 0x22f   :  { %1259 = vrcp.f32 %v460_v63 }
 0x232   :  { %v1258_v1 = vpop.eup %1257 }
 0x233   :  { %v462_v2 = vmul.f32 %v1258_v1, %v453_v56 }
 0x235   :  { %v464_v5 = vsel %vm463_vm13, %v453_v56, %v462_v2 }
 0x236   :  { %v467_v6 = vsel %vm465_vm14, %v466_v4, %v464_v5 }
 0x237   :  { %1261 = vrcp.f32 %v467_v6 }
 0x239   :  { %v1260_v9 = vpop.eup %1259 }
 0x23a   :  { %v469_v11 = vmul.f32 %v1260_v9, %v448_v8  ;;  %v470_v14 = vmul.f32 %v1260_v9, %v449_v7 }
 0x23c   :  { %v1484_v12 = vadd.f32 %v1129_v10, %v469_v11  ;;  %v1486_v13 = vadd.f32 %v1129_v10, %v470_v14 }
 0x23e   :  { %v653_v21 = vadd.f32 1.0, %v1484_v12  ;;  %v654_v24 = vadd.f32 1.0, %v1486_v13  ;;  %v809_v49 = vadd.f32 2.0, %v1484_v12  ;;  %v810_v50 = vadd.f32 2.0, %v1486_v13 }
 0x240   :  { %v657_v25 = vmax.f32 %v653_v21, 0.0  ;;  %v658_v26 = vmax.f32 %v654_v24, 0.0  ;;  %v813_v27 = vmax.f32 %v809_v49, 0.0  ;;  %v814_v29 = vmax.f32 %v810_v50, 0.0 }
 0x241   :  { %v1262_v33 = vpop.eup %1261 }
 0x242   :  { %v1493_v35 = vmin.f32 %v657_v25, 2.0  ;;  %v1495_v37 = vmin.f32 %v658_v26, 2.0  ;;  %v817_v38 = vmin.f32 %v813_v27, 2.0  ;;  %v1497_v40 = vmin.f32 %v814_v29, 2.0 }
 0x243   :  { %v473_v43 = vmul.f32 %v1262_v33, %v451_v32  ;;  %v472_v56 = vmul.f32 %v1262_v33, %v450_v48 }
 0x244   :  { %v665_v44 = vand.u32 2147483647, %v1493_v35  ;;  %v1138_v45 = vadd.f32 -1.0, %v1493_v35  ;;  %v666_v46 = vand.u32 2147483647, %v1495_v37  ;;  %v1150_v47 = vadd.f32 -2.0, %v817_v38 }
 0x245   :  { %v1503_v51 = vadd.f32 %v1129_v10, %v473_v43  ;;  %v1151_v54 = vadd.f32 -2.0, %v1497_v40  ;;  %v821_v62 = vand.u32 2147483647, %v817_v38  ;;  %v1510_v5 = vadd.f32 %v1129_v10, %v472_v56 }
 0x246   :  { %v669_v58 = vsub.f32 1.0, %v665_v44  ;;  %v705_v52 = vand.u32 2147483647, %v1138_v45  ;;  %v905_v53 = vand.u32 2147483647, %v1150_v47  ;;  %v670_v61 = vsub.f32 1.0, %v666_v46 }
 0x247   :  { %v812_v55 = vadd.f32 2.0, %v1503_v51  ;;  %v656_v2 = vadd.f32 1.0, %v1503_v51  ;;  %v906_v3 = vand.u32 2147483647, %v1151_v54  ;;  %v825_v8 = vsub.f32 1.0, %v821_v62 }
 0x248   :  { %v673_v57 = vmax.f32 %v669_v58, 0.0  ;;  %v709_v60 = vsub.f32 1.0, %v705_v52  ;;  %v909_v59 = vsub.f32 1.0, %v905_v53  ;;  %v674_v6 = vmax.f32 %v670_v61, 0.0 }
 0x249   :  { %v816_v63 = vmax.f32 %v812_v55, 0.0  ;;  %v660_v7 = vmax.f32 %v656_v2, 0.0  ;;  %v822_v9 = vand.u32 2147483647, %v1497_v40  ;;  %v655_v11 = vadd.f32 1.0, %v1510_v5 }
 0x24a   :  { %679 = vperm.xlu1 %1223, %v673_v57   ;;  %v713_v1 = vmax.f32 %v709_v60, 0.0  ;;  %v1139_v14 = vadd.f32 -1.0, %v1495_v37  ;;  %v913_v24 = vmax.f32 %v909_v59, 0.0  ;;  %v910_v49 = vsub.f32 1.0, %v906_v3 }
 0x24b   :  { %v1508_v4 = vmin.f32 %v816_v63, 2.0  ;;  %v1515_v21 = vmin.f32 %v660_v7, 2.0  ;;  %v659_v25 = vmax.f32 %v655_v11, 0.0  ;;  %v1274_v10 = vmov 2  }
 0x24c   :  { %719 = vperm.xlu0 %1225, %v713_v1   ;;  %v829_v27 = vmax.f32 %v825_v8, 0.0  ;;  %v826_v29 = vsub.f32 1.0, %v822_v9  ;;  %v706_v33 = vand.u32 2147483647, %v1139_v14  ;;  %v914_v43 = vmax.f32 %v910_v49, 0.0 }
 0x24d   :  { %v824_v50 = vand.u32 2147483647, %v1508_v4  ;;  %v1141_v26 = vadd.f32 -1.0, %v1515_v21  ;;  %v1520_v32 = vmin.f32 %v659_v25, 2.0  ;;  %v1146_v45 = vadd.f32 -1.0, %v817_v38 }
 0x24e   :  { %684 = vperm.xlu1 %1223, %v674_v6   ;;  %v830_v48 = vmax.f32 %v826_v29, 0.0  ;;  %v710_v58 = vsub.f32 1.0, %v706_v33  ;;  %v1142_v56 = vadd.f32 -2.0, %v1493_v35  ;;  %v1153_v57 = vadd.f32 -2.0, %v1508_v4 }
 0x24f   :  { %v828_v44 = vsub.f32 1.0, %v824_v50  ;;  %v708_v46 = vand.u32 2147483647, %v1141_v26  ;;  %v1144_v47 = vadd.f32 -2.0, %v1520_v32  ;;  %v861_v53 = vand.u32 2147483647, %v1146_v45 }
 0x250   :  { %1231 = vset.pattern.permute.xlu0 %v1274_v10  ;;  %v714_v60 = vmax.f32 %v710_v58, 0.0  ;;  %v749_v63 = vand.u32 2147483647, %v1142_v56  ;;  %v908_v1 = vand.u32 2147483647, %v1153_v57  ;;  %v1147_v2 = vadd.f32 -1.0, %v1497_v40 }
 0x251   :  { %919 = vperm.xlu0 %1231, %v913_v24   ;;  %v832_v52 = vmax.f32 %v828_v44, 0.0  ;;  %v712_v54 = vsub.f32 1.0, %v708_v46  ;;  %v751_v55 = vand.u32 2147483647, %v1144_v47  ;;  %v865_v38 = vsub.f32 1.0, %v861_v53 }
 0x252   :  { %1224 = vset.pattern.permute.xlu1 %v1274_v10  ;;  %v753_v3 = vsub.f32 1.0, %v749_v63  ;;  %v912_v6 = vsub.f32 1.0, %v908_v1  ;;  %v862_v7 = vand.u32 2147483647, %v1147_v2  ;;  %v1143_v8 = vadd.f32 -2.0, %v1495_v37 }
 0x253   :  { %835 = vperm.xlu1 %1224, %v829_v27   ;;  %v716_v61 = vmax.f32 %v712_v54, 0.0  ;;  %v755_v62 = vsub.f32 1.0, %v751_v55  ;;  %v869_v59 = vmax.f32 %v865_v38, 0.0  ;;  %v811_v24 = vadd.f32 2.0, %v1510_v5 }
 0x254   :  { %v757_v9 = vmax.f32 %v753_v3, 0.0  ;;  %v916_v11 = vmax.f32 %v912_v6, 0.0  ;;  %v866_v14 = vsub.f32 1.0, %v862_v7  ;;  %v750_v40 = vand.u32 2147483647, %v1143_v8 }
 0x255   :  { %924 = vperm.xlu0 %1231, %v914_v43   ;;  %v759_v35 = vmax.f32 %v755_v62, 0.0  ;;  %v667_v25 = vand.u32 2147483647, %v1520_v32  ;;  %v815_v37 = vmax.f32 %v811_v24, 0.0  ;;  %v668_v29 = vand.u32 2147483647, %v1515_v21 }
 0x256   :  { %v870_v49 = vmax.f32 %v866_v14, 0.0  ;;  %v754_v50 = vsub.f32 1.0, %v750_v40  ;;  %v1140_v46 = vadd.f32 -1.0, %v1520_v32  ;;  %v1149_v56 = vadd.f32 -1.0, %v1508_v4 }
 0x257   :  { %840 = vperm.xlu1 %1224, %v830_v48   ;;  %v671_v27 = vsub.f32 1.0, %v667_v25  ;;  %v819_v33 = vmin.f32 %v815_v37, 2.0  ;;  %v672_v44 = vsub.f32 1.0, %v668_v29  ;;  %v1145_v32 = vadd.f32 -2.0, %v1515_v21 }
 0x258   :  { %v758_v26 = vmax.f32 %v754_v50, 0.0  ;;  %v707_v58 = vand.u32 2147483647, %v1140_v46  ;;  %v489_v4 = vmax.f32 %v1484_v12, 0.0  ;;  %v490_v6 = vmax.f32 %v1486_v13, 0.0 }
 0x259   :  { %850 = vperm.xlu0 %1231, %v832_v52   ;;  %v675_v43 = vmax.f32 %v671_v27, 0.0  ;;  %v823_v45 = vand.u32 2147483647, %v819_v33  ;;  %v676_v47 = vmax.f32 %v672_v44, 0.0  ;;  %v1148_v52 = vadd.f32 -1.0, %v819_v33 }
 0x25a   :  { %v711_v54 = vsub.f32 1.0, %v707_v58  ;;  %v752_v1 = vand.u32 2147483647, %v1145_v32  ;;  %v1152_v2 = vadd.f32 -2.0, %v819_v33  ;;  %v1552_v40 = vmin.f32 %v490_v6, 2.0 }
 0x25b   :  { %1226 = vset.pattern.permute.xlu1 %v1273_v0  ;;  %v827_v48 = vsub.f32 1.0, %v823_v45  ;;  %v863_v55 = vand.u32 2147483647, %v1148_v52  ;;  %v1275_v58 = vmov 0  }
 0x25c   :  { %724 = vperm.xlu1 %1226, %v714_v60   ;;  %v715_v57 = vmax.f32 %v711_v54, 0.0  ;;  %v756_v3 = vsub.f32 1.0, %v752_v1  ;;  %v907_v7 = vand.u32 2147483647, %v1152_v2  ;;  %v1131_v24 = vadd.f32 -1.0, %v1552_v40 }
 0x25d   :  { %1234 = vset.pattern.permute.xlu0 %v1273_v0  ;;  %v831_v53 = vmax.f32 %v827_v48, 0.0  ;;  %v867_v38 = vsub.f32 1.0, %v863_v55  ;;  %v1135_v29 = vadd.f32 -2.0, %v1552_v40  ;;  %v498_v2 = vand.u32 2147483647, %v1552_v40 }
 0x25e   :  { %734 = vperm.xlu0 %1234, %v716_v61   ;;  %v864_v61 = vand.u32 2147483647, %v1149_v56  ;;  %v760_v14 = vmax.f32 %v756_v3, 0.0  ;;  %v911_v12 = vsub.f32 1.0, %v907_v7  ;;  %v538_v27 = vand.u32 2147483647, %v1131_v24 }
 0x25f   :  { %v871_v62 = vmax.f32 %v867_v38, 0.0  ;;  %v586_v46 = vand.u32 2147483647, %v1135_v29 }
 0x260   :  { %1227 = vset.pattern.permute.xlu1 %v1274_v10  ;;  %v868_v63 = vsub.f32 1.0, %v864_v61  ;;  %v542_v45 = vsub.f32 1.0, %v538_v27 }
 0x261   :  { %875 = vperm.xlu1 %1227, %v869_v59  }
 0x262   :  { %773 = vperm.xlu0 %1234, %v759_v35   ;;  %v872_v35 = vmax.f32 %v868_v63, 0.0  ;;  %v546_v52 = vmax.f32 %v542_v45, 0.0 }
 0x265   :  { %1228 = vset.pattern.permute.xlu1 %v1273_v0 }
 0x266   :  { %763 = vperm.xlu1 %1228, %v757_v9   ;;  %1238 = vset.pattern.permute.xlu0 %v1274_v10 }
 0x267   :  { %934 = vperm.xlu0 %1238, %v916_v11   ;;  %v1550_v11 = vmin.f32 %v489_v4, 2.0 }
 0x269   :  { %v497_v13 = vand.u32 2147483647, %v1550_v11  ;;  %v1130_v32 = vadd.f32 -1.0, %v1550_v11 }
 0x26a   :  { %1229 = vset.pattern.permute.xlu1 %v1274_v10 }
 0x26b   :  { %880 = vperm.xlu1 %1229, %v870_v49   ;;  %1239 = vset.pattern.permute.xlu0 %v1273_v0  ;;  %v491_v49 = vmax.f32 %v1510_v5, 0.0  ;;  %v501_v37 = vsub.f32 1.0, %v497_v13  ;;  %v537_v63 = vand.u32 2147483647, %v1130_v32 }
 0x26d   :  { %v495_v33 = vmin.f32 %v491_v49, 2.0  ;;  %v505_v5 = vmax.f32 %v501_v37, 0.0  ;;  %v541_v1 = vsub.f32 1.0, %v537_v63 }
 0x26f   :  { %1230 = vset.pattern.permute.xlu1 %v1273_v0  ;;  %v499_v6 = vand.u32 2147483647, %v495_v33 }
 0x270   :  { %768 = vperm.xlu1 %1230, %v758_v26  }
 0x274   :  { %689 = vperm.xlu1 %1230, %v675_v43   ;;  %v492_v43 = vmax.f32 %v1503_v51, 0.0  ;;  %v590_v51 = vsub.f32 1.0, %v586_v46 }
 0x276   :  { %v496_v48 = vmin.f32 %v492_v43, 2.0  ;;  %v594_v55 = vmax.f32 %v590_v51, 0.0 }
 0x278   :  { %694 = vperm.xlu1 %1230, %v676_v47   ;;  %v1132_v47 = vadd.f32 -1.0, %v495_v33  ;;  %v1133_v54 = vadd.f32 -1.0, %v496_v48 }
 0x27c   :  { %1232 = vset.pattern.permute.xlu1 %v1274_v10 }
 0x27d   :  { %845 = vperm.xlu1 %1232, %v831_v53   ;;  %v539_v53 = vand.u32 2147483647, %v1132_v47 }
 0x27f   :  { %v543_v56 = vsub.f32 1.0, %v539_v53 }
 0x281   :  { %1233 = vset.pattern.permute.xlu1 %v1273_v0  ;;  %v547_v61 = vmax.f32 %v543_v56, 0.0 }
 0x282   :  { %v254_v60 = vpop.xlane.xlu0 %253  ;;  %729 = vperm.xlu1 %1233, %v715_v57   ;;  %v540_v57 = vand.u32 2147483647, %v1133_v54 }
 0x283   :  { %1263 = vrcp.f32 %v254_v60  ;;  %v251_v9 = vpop.xlane.xlu1 %250 }
 0x286   :  { %1235 = vset.pattern.permute.xlu1 %v1274_v10 }
 0x287   :  { %885 = vperm.xlu1 %1235, %v871_v62  }
 0x28a   :  { %v260_v59 = vpop.xlane.xlu0 %259 }
 0x28b   :  { %1265 = vrcp.f32 %v260_v59  ;;  %890 = vperm.xlu1 %1235, %v872_v35   ;;  %v257_v26 = vpop.xlane.xlu1 %256  ;;  %v502_v59 = vsub.f32 1.0, %v498_v2 }
 0x28c   :  { %1267 = vrcp.f32 %v251_v9  ;;  %v500_v9 = vand.u32 2147483647, %v496_v48 }
 0x28d   :  { %v1264_v8 = vpop.eup %1263  ;;  %1269 = vrcp.f32 %v257_v26  ;;  %v506_v4 = vmax.f32 %v502_v59, 0.0 }
 0x28e   :  { %v1548_v21 = vmul.f32 %v1264_v8, %v1460_v17  ;;  %v915_v17 = vmax.f32 %v911_v12, 0.0  ;;  %v503_v8 = vsub.f32 1.0, %v499_v6  ;;  %v504_v40 = vsub.f32 1.0, %v500_v9 }
 0x28f   :  { %1236 = vset.pattern.permute.xlu1 %v1273_v0  ;;  %v1137_v12 = vadd.f32 -2.0, %v496_v48 }
 0x290   :  { %794 = vperm.xlu0 %1239, %v1548_v21   ;;  %778 = vperm.xlu1 %1236, %v760_v14   ;;  %v1136_v14 = vadd.f32 -2.0, %v495_v33  ;;  %v508_v13 = vmax.f32 %v504_v40, 0.0 }
 0x291   :  { %v588_v49 = vand.u32 2147483647, %v1137_v12 }
 0x294   :  { %1237 = vset.pattern.permute.xlu1 %v1274_v10 }
 0x295   :  { %v1266_v50 = vpop.eup %1265  ;;  %929 = vperm.xlu1 %1237, %v915_v17  }
 0x296   :  { %v268_v25 = vmul.f32 %v1266_v50, %v1468_v23  ;;  %v1268_v44 = vpop.eup %1267  ;;  %v592_v50 = vsub.f32 1.0, %v588_v49 }
 0x297   :  { %v262_v23 = vmul.f32 %v1268_v44, %v1462_v22  ;;  %v1270_v60 = vpop.eup %1269  ;;  %v544_v22 = vsub.f32 1.0, %v540_v57 }
 0x298   :  { %802 = vperm.xlu0 %1239, %v268_v25   ;;  %v266_v38 = vmul.f32 %v1270_v60, %v1470_v18  ;;  %v1134_v18 = vadd.f32 -2.0, %v1550_v11  ;;  %v507_v11 = vmax.f32 %v503_v8, 0.0  ;;  %v596_v37 = vmax.f32 %v592_v50, 0.0 }
 0x299   :  { %950 = vperm.xlu1 %1237, %v1548_v21   ;;  %v548_v62 = vmax.f32 %v544_v22, 0.0 }
 0x29a   :  { %v585_v35 = vand.u32 2147483647, %v1134_v18 }
 0x29c   :  { %1244 = vset.pattern.permute.xlu0 %v1275_v58  ;;  %v589_v3 = vsub.f32 1.0, %v585_v35  ;;  %v1005_v35 = vld [vmem:[%s1674_s6] sm:$0xff] }
 0x29d   :  { %511 = vperm.xlu0 %1244, %v505_v5   ;;  %1240 = vset.pattern.permute.xlu1 %v1273_v0 }
 0x29e   :  { %790 = vperm.xlu1 %1240, %v262_v23   ;;  %v593_v7 = vmax.f32 %v589_v3, 0.0 }
 0x2a1   :  { %556 = vperm.xlu0 %1244, %v546_v52  }
 0x2a2   :  { %1241 = vset.pattern.permute.xlu1 %v1274_v10 }
 0x2a3   :  { %946 = vperm.xlu1 %1241, %v262_v23  }
 0x2a5   :  { %604 = vperm.xlu0 %1244, %v594_v55  }
 0x2a7   :  { %1242 = vset.pattern.permute.xlu1 %v1273_v0  ;;  %v545_v0 = vmax.f32 %v541_v1, 0.0 }
 0x2a8   :  { %798 = vperm.xlu1 %1242, %v266_v38  }
 0x2a9   :  { %561 = vperm.xlu0 %1244, %v547_v61  }
 0x2ac   :  { %1243 = vset.pattern.permute.xlu1 %v1274_v10 }
 0x2ad   :  { %566 = vperm.xlu0 %1244, %v548_v62   ;;  %954 = vperm.xlu1 %1243, %v266_v38  }
 0x2b1   :  { %631 = vperm.xlu0 %1244, %v262_v23   ;;  %958 = vperm.xlu1 %1243, %v268_v25  }
 0x2b5   :  { %636 = vperm.xlu0 %1244, %v1548_v21   ;;  %1245 = vset.pattern.permute.xlu1 %v1275_v58  ;;  %v587_v21 = vand.u32 2147483647, %v1136_v14 }
 0x2b6   :  { %551 = vperm.xlu1 %1245, %v545_v0  }
 0x2b7   :  { %v591_v24 = vsub.f32 1.0, %v587_v21 }
 0x2b9   :  { %646 = vperm.xlu0 %1244, %v268_v25   ;;  %v595_v17 = vmax.f32 %v591_v24, 0.0 }
 0x2ba   :  { %516 = vperm.xlu1 %1245, %v506_v4   ;;  %v1006_v4 = vld [vmem:[%s1674_s6 + $0x8] sm:$0xff] }
 0x2bd   :  { %1246 = vset.pattern.permute.xlu0 %v1274_v10 }
 0x2be   :  { %599 = vperm.xlu1 %1245, %v593_v7   ;;  %v1214_v7 = vpack.c.bf16 %v1006_v4, %v1005_v35 }
 0x2c0   :  { %1215 = vmatprep.subr.bf16.mxu1 %v1214_v7 }
 0x2c1   :  { %1217 = vmatpush3.bf16.msra.mxu1 %v1214_v7 }
 0x2c2   :  { %521 = vperm.xlu1 %1245, %v507_v11  }
 0x2c6   :  { %526 = vperm.xlu1 %1245, %v508_v13   ;;  %v1007_v13 = vld [vmem:[%s1674_s6 + $0x10] sm:$0xff] }
 0x2c7   :  { %1202 = vmatprep.subr.mxu1 %v1007_v13 }
 0x2c8   :  { %1203 = vmatpush3.msra.mxu1 %v1007_v13 }
 0x2c9   :  { %v680_v25 = vpop.permute.xlu1 %679 }
 0x2ca   :  { %609 = vperm.xlu1 %1245, %v595_v17   ;;  %v697_v40 = vmul.f32 %v680_v25, %v1344_v15 }
 0x2cb   :  { %v720_v44 = vpop.permute.xlu0 %719 }
 0x2cc   :  { %v737_v8 = vmul.f32 %v720_v44, %v1366_v28 }
 0x2cd   :  { %v685_v26 = vpop.permute.xlu1 %684 }
 0x2ce   :  { %614 = vperm.xlu1 %1245, %v596_v37   ;;  %v698_v57 = vmul.f32 %v685_v26, %v1347_v16  ;;  %v741_v50 = vadd.f32 %v737_v8, %v697_v40 }
 0x2d0   :  { %v920_v45 = vpop.permute.xlu0 %919 }
 0x2d2   :  { %v836_v27 = vpop.permute.xlu1 %835  ;;  %641 = vperm.xlu1 %1245, %v266_v38  }
 0x2d3   :  { %v853_v26 = vmul.f32 %v836_v27, %v1344_v15 }
 0x2d4   :  { %v925_v47 = vpop.permute.xlu0 %924 }
 0x2d5   :  { %v938_v3 = vmul.f32 %v925_v47, %v1383_v34 }
 0x2d6   :  { %v841_v10 = vpop.permute.xlu1 %840 }
 0x2d7   :  { %v854_v18 = vmul.f32 %v841_v10, %v1347_v16 }
 0x2d8   :  { %v1575_v23 = vpop.permute.xlu0 %850 }
 0x2db   :  { %v725_v29 = vpop.permute.xlu1 %724 }
 0x2dc   :  { %v738_v56 = vmul.f32 %v725_v29, %v1378_v31 }
 0x2dd   :  { %v735_v51 = vpop.permute.xlu0 %734 }
 0x2de   :  { %v742_v22 = vadd.f32 %v738_v56, %v698_v57  ;;  %v740_v9 = vmul.f32 %v735_v51, %v1395_v39 }
 0x2e0   :  { %v876_v33 = vpop.permute.xlu1 %875 }
 0x2e1   :  { %v774_v54 = vpop.permute.xlu0 %773  ;;  %v893_v24 = vmul.f32 %v876_v33, %v1366_v28  ;;  %v937_v33 = vmul.f32 %v920_v45, %v1373_v30 }
 0x2e2   :  { %v783_v57 = vmul.f32 %v774_v54, %v1402_v41 }
 0x2e3   :  { %v897_v29 = vadd.f32 %v893_v24, %v853_v26 }
 0x2e5   :  { %v764_v43 = vpop.permute.xlu1 %763  ;;  %v941_v27 = vadd.f32 %v937_v33, %v897_v29 }
 0x2e6   :  { %v1582_v38 = vpop.permute.xlu0 %934  ;;  %v781_v21 = vmul.f32 %v764_v43, %v1373_v30 }
 0x2e8   :  { %v785_v25 = vadd.f32 %v781_v21, %v741_v50 }
 0x2ea   :  { %v881_v5 = vpop.permute.xlu1 %880 }
 0x2eb   :  { %v894_v63 = vmul.f32 %v881_v5, %v1378_v31 }
 0x2ed   :  { %v898_v0 = vadd.f32 %v894_v63, %v854_v18  ;;  %v856_v63 = vmul.f32 %v1575_v23, %v1356_v20  ;;  %v940_v18 = vmul.f32 %v1582_v38, %v1405_v42 }
 0x2ef   :  { %v769_v46 = vpop.permute.xlu1 %768  ;;  %v942_v11 = vadd.f32 %v938_v3, %v898_v0 }
 0x2f0   :  { %v782_v60 = vmul.f32 %v769_v46, %v1383_v34 }
 0x2f2   :  { %v786_v32 = vadd.f32 %v782_v60, %v742_v22 }
 0x2f3   :  { %v690_v48 = vpop.permute.xlu1 %689 }
 0x2f4   :  { %v699_v47 = vmul.f32 %v690_v48, %v1352_v19 }
 0x2f7   :  { %v695_v58 = vpop.permute.xlu1 %694 }
 0x2f8   :  { %v700_v6 = vmul.f32 %v695_v58, %v1356_v20 }
 0x2fa   :  { %v744_v49 = vadd.f32 %v740_v9, %v700_v6 }
 0x2fc   :  { %v1577_v52 = vpop.permute.xlu1 %845 }
 0x2fd   :  { %v855_v45 = vmul.f32 %v1577_v52, %v1352_v19 }
 0x301   :  { %v730_v53 = vpop.permute.xlu1 %729 }
 0x302   :  { %v739_v5 = vmul.f32 %v730_v53, %v1390_v36 }
 0x304   :  { %v743_v58 = vadd.f32 %v739_v5, %v699_v47 }
 0x306   :  { %v886_v55 = vpop.permute.xlu1 %885  ;;  %v787_v53 = vadd.f32 %v783_v57, %v743_v58 }
 0x307   :  { %v895_v60 = vmul.f32 %v886_v55, %v1390_v36 }
 0x30a   :  { %v891_v61 = vpop.permute.xlu1 %890 }
 0x30b   :  { %v896_v22 = vmul.f32 %v891_v61, %v1395_v39 }
 0x30d   :  { %v900_v54 = vadd.f32 %v896_v22, %v856_v63 }
 0x30f   :  { %v795_v62 = vpop.permute.xlu0 %794  ;;  %v779_v2 = vpop.permute.xlu1 %778  ;;  %v944_v52 = vadd.f32 %v940_v18, %v900_v54 }
 0x310   :  { %v806_v1 = vmul.f32 %v795_v62, %v786_v32  ;;  %v784_v14 = vmul.f32 %v779_v2, %v1405_v42 }
 0x312   :  { %971 = vrot.lane.b32.xlu0 %v806_v1, %s1271_s19  ;;  %v788_v10 = vadd.f32 %v784_v14, %v744_v49  ;;  %v899_v1 = vadd.f32 %v895_v60, %v855_v45 }
 0x314   :  { %v930_v59 = vpop.permute.xlu1 %929 }
 0x315   :  { %v939_v48 = vmul.f32 %v930_v59, %v1402_v41 }
 0x317   :  { %v803_v37 = vpop.permute.xlu0 %802  ;;  %v943_v55 = vadd.f32 %v939_v48, %v899_v1 }
 0x318   :  { %v951_v12 = vpop.permute.xlu1 %950  ;;  %v808_v43 = vmul.f32 %v803_v37, %v788_v10 }
 0x319   :  { %v962_v17 = vmul.f32 %v951_v12, %v942_v11 }
 0x31b   :  { %987 = vrot.lane.b32.xlu0 %v962_v17, %s1272_s20 }
 0x31c   :  { %v512_v35 = vpop.permute.xlu0 %511 }
 0x31d   :  { %v791_v44 = vpop.permute.xlu1 %790  ;;  %v529_v17 = vmul.f32 %v512_v35, %v1344_v15 }
 0x31e   :  { %v805_v46 = vmul.f32 %v791_v44, %v785_v25 }
 0x31f   :  { %975 = vrot.lane.b32.xlu0 %v808_v43, %s1271_s19 }
 0x320   :  { %969 = vrot.lane.b32.xlu1 %v805_v46, %s1271_s19  ;;  %v557_v23 = vpop.permute.xlu0 %556 }
 0x321   :  { %v574_v49 = vmul.f32 %v557_v23, %v1378_v31 }
 0x322   :  { %v947_v51 = vpop.permute.xlu1 %946 }
 0x323   :  { %v961_v56 = vmul.f32 %v947_v51, %v941_v27 }
 0x324   :  { %v605_v6 = vpop.permute.xlu0 %604 }
 0x325   :  { %985 = vrot.lane.b32.xlu1 %v961_v56, %s1272_s20  ;;  %v622_v29 = vmul.f32 %v605_v6, %v1383_v34 }
 0x327   :  { %v799_v32 = vpop.permute.xlu1 %798 }
 0x328   :  { %v807_v62 = vmul.f32 %v799_v32, %v787_v53  ;;  %v562_v8 = vpop.permute.xlu0 %561 }
 0x329   :  { %v575_v58 = vmul.f32 %v562_v8, %v1390_v36 }
 0x32a   :  { %973 = vrot.lane.b32.xlu1 %v807_v62, %s1271_s19 }
 0x32c   :  { %v955_v2 = vpop.permute.xlu1 %954  ;;  %v567_v14 = vpop.permute.xlu0 %566 }
 0x32d   :  { %v963_v0 = vmul.f32 %v955_v2, %v943_v55 }
 0x32f   :  { %989 = vrot.lane.b32.xlu1 %v963_v0, %s1272_s20 }
 0x330   :  { %v959_v61 = vpop.permute.xlu1 %958  ;;  %v632_v40 = vpop.permute.xlu0 %631 }
 0x331   :  { %v964_v59 = vmul.f32 %v959_v61, %v944_v52 }
 0x333   :  { %991 = vrot.lane.b32.xlu0 %v964_v59, %s1272_s20 }
 0x334   :  { %v637_v21 = vpop.permute.xlu0 %636 }
 0x335   :  { %v552_v4 = vpop.permute.xlu1 %551 }
 0x336   :  { %v573_v24 = vmul.f32 %v552_v4, %v1366_v28 }
 0x338   :  { %v647_v37 = vpop.permute.xlu0 %646  ;;  %v577_v25 = vadd.f32 %v573_v24, %v529_v17 }
 0x339   :  { %v517_v3 = vpop.permute.xlu1 %516 }
 0x33a   :  { %v530_v13 = vmul.f32 %v517_v3, %v1347_v16 }
 0x33c   :  { %v578_v26 = vadd.f32 %v574_v49, %v530_v13 }
 0x33d   :  { %v600_v7 = vpop.permute.xlu1 %599 }
 0x33e   :  { %v621_v50 = vmul.f32 %v600_v7, %v1373_v30  ;;  %v626_v44 = vadd.f32 %v622_v29, %v578_v26 }
 0x340   :  { %v625_v43 = vadd.f32 %v621_v50, %v577_v25  ;;  %v650_v16 = vmul.f32 %v637_v21, %v626_v44 }
 0x341   :  { %v522_v9 = vpop.permute.xlu1 %521 }
 0x342   :  { %v649_v33 = vmul.f32 %v632_v40, %v625_v43  ;;  %v531_v28 = vmul.f32 %v522_v9, %v1352_v19  ;;  %v576_v19 = vmul.f32 %v567_v14, %v1395_v39 }
 0x344   :  { %v579_v57 = vadd.f32 %v575_v58, %v531_v28 }
 0x345   :  { %v527_v11 = vpop.permute.xlu1 %526 }
 0x346   :  { %v532_v34 = vmul.f32 %v527_v11, %v1356_v20 }
 0x348   :  { %v580_v45 = vadd.f32 %v576_v19, %v532_v34 }
 0x349   :  { %v610_v38 = vpop.permute.xlu1 %609 }
 0x34a   :  { %v623_v51 = vmul.f32 %v610_v38, %v1402_v41 }
 0x34c   :  { %v627_v22 = vadd.f32 %v623_v51, %v579_v57 }
 0x34d   :  { %v615_v12 = vpop.permute.xlu1 %614 }
 0x34e   :  { %v624_v60 = vmul.f32 %v615_v12, %v1405_v42  ;;  %v1154_v42 = vld [vmem:[%s1675_s7] ss:$0 sm:$0xff] }
 0x350   :  { %v628_v48 = vadd.f32 %v624_v60, %v580_v45 }
 0x351   :  { %v642_v10 = vpop.permute.xlu1 %641 }
 0x352   :  { %v651_v36 = vmul.f32 %v642_v10, %v627_v22  ;;  %v652_v63 = vmul.f32 %v647_v37, %v628_v48 }
 0x384   :  { %v972_v5 = vpop.permute.xlu0 %971 }
 0x385   :  { %v998_v30 = vsel %vm113_vm0, %v650_v16, %v972_v5 }
 0x38d   :  { %v988_v47 = vpop.permute.xlu0 %987 }
 0x38e   :  { %v1002_v56 = vsel %vm118_vm4, %v998_v30, %v988_v47 }
 0x391   :  { %v976_v32 = vpop.permute.xlu0 %975 }
 0x392   :  { %v970_v46 = vpop.permute.xlu1 %969  ;;  %v1000_v1 = vsel %vm113_vm0, %v652_v63, %v976_v32 }
 0x393   :  { %v997_v31 = vsel %vm113_vm0, %v649_v33, %v970_v46 }
 0x397   :  { %v986_v15 = vpop.permute.xlu1 %985 }
 0x398   :  { %v1001_v27 = vsel %vm118_vm4, %v997_v31, %v986_v15 }
 0x399   :  { %1204 = vmatprep.mubr.msk.f32.mxu1 %vm126_vm5, %v1001_v27 }
 0x39a   :  { %1205 = vmatmul.mubr.msk.f32.vlgmr.msra.gmra.mrb[4].mxu1 %vm126_vm5, %v1002_v56 }
 0x39c   :  { %v974_v53 = vpop.permute.xlu1 %973 }
 0x39d   :  { %v999_v20 = vsel %vm113_vm0, %v651_v36, %v974_v53 }
 0x3a1   :  { %v990_v41 = vpop.permute.xlu1 %989 }
 0x3a2   :  { %v1003_v62 = vsel %vm118_vm4, %v999_v20, %v990_v41 }
 0x3a3   :  { %1207 = vmatprep.mubr.msk.f32.mxu1 %vm126_vm5, %v1003_v62 }
 0x3a5   :  { %v992_v39 = vpop.permute.xlu0 %991 }
 0x3a6   :  { %v1004_v54 = vsel %vm118_vm4, %v1000_v1, %v992_v39 }
 0x3a7   :  { %1208 = vmatmul.mubr.msk.f32.gmra.mrb[6].mxu1 %vm126_vm5, %v1004_v54 }
 0x46d   :  { %v1206_v55 = vpop.f32.mrb[4].mxu1 }
 0x46e   :  { %v1099_v2 = vadd.f32 %v1206_v55, %v1154_v42  ;;  %v1093_v18 = vpop.f32.mrb[5].mxu1 }
 0x46f   :  { %v1094_v0 = vadd.f32 %v1154_v42, %v1093_v18 }
 0x470   :  { %1113 = vst.msk [vmem:[%s1676_s8 + $0x8] sm:$0xff] %vm113_vm0, %v1099_v2 }
 0x471   :  { %1112 = vst.msk [vmem:[%s1676_s8] sm:$0xff] %vm113_vm0, %v1094_v0 }
 0x47a   :  { %v1209_v52 = vpop.f32.mrb[6].mxu1 }
 0x47b   :  { %v1109_v61 = vadd.f32 %v1209_v52, %v1154_v42  ;;  %v1103_v59 = vpop.f32.mrb[7].mxu1 }
 0x47c   :  { %v1104_v35 = vadd.f32 %v1154_v42, %v1103_v59 }
 0x47d   :  { %1115 = vst.msk [vmem:[%s1676_s8 + $0x18] sm:$0xff] %vm113_vm0, %v1109_v61 }
 0x47e   :  { %1114 = vst.msk [vmem:[%s1676_s8 + $0x10] sm:$0xff] %vm113_vm0, %v1104_v35 }

</bundles_post_ra>
